<compile_context>
chip_gen: v6e
topology: v6e:2x2x1
jax: 0.10.0
libtpu: 0.0.40
codegen_flags: <defaults>
</compile_context>

<pallas_src>
import functools

import jax
import jax.numpy as jnp
from jax.experimental import pallas as pl
from jax.experimental.pallas import tpu as pltpu

_NEG_SLOPE = 0.01  # PyTorch nn.LeakyReLU default


def _leaky_relu(v):
    return jnp.where(v > 0, v, _NEG_SLOPE * v)


def _mlp_kernel(x_ref, w1_ref, b1_ref, w2_ref, b2_ref, w3_ref, b3_ref, o_ref):
    """Whole forward pass for one batch tile, transposed layout.

    x_ref : (in_dim, tile_n)   -- batch on the lane axis
    wN    : (out, in), bN : (out, 1)
    o_ref : (1, tile_n)
    """
    x = x_ref[...].astype(jnp.float32)            # (in_dim, tile_n)
    w1 = w1_ref[...]                              # (64, in_dim)
    in_dim = w1.shape[1]

    # ---- Linear(in_dim -> 64) + LeakyReLU ----
    if in_dim < 8:
        # K < 8 matmul is an outer product: the MXU would be nearly idle, so do
        # it on the VPU as broadcast multiply-adds over dense (*, tile_n) vregs.
        h1 = b1_ref[...]                          # (64, 1) broadcasts over lanes
        for k in range(in_dim):
            h1 = h1 + w1[:, k:k + 1] * x[k:k + 1, :]
    else:
        h1 = jnp.dot(w1, x, preferred_element_type=jnp.float32) + b1_ref[...]
    h1 = _leaky_relu(h1)                          # (64, tile_n)

    # ---- Linear(64 -> 32) + LeakyReLU ----  (MXU, N = tile_n >= 128)
    h2 = jnp.dot(w2_ref[...], h1, preferred_element_type=jnp.float32) + b2_ref[...]
    h2 = _leaky_relu(h2)                          # (32, tile_n)

    # ---- Linear(32 -> 1) + Sigmoid ----
    h3 = jnp.dot(w3_ref[...], h2, preferred_element_type=jnp.float32) + b3_ref[...]
    h3 = jnp.clip(h3, -60.0, 60.0)                # keep exp finite; sigmoid saturated anyway
    e = jnp.exp(-h3)                              # EUP
    d = 1.0 + e
    r = pl.reciprocal(d, approx=True)             # EUP rcp (free slot)
    r = r * (2.0 - d * r)                         # one Newton step -> ~full f32 accuracy
    o_ref[...] = r.astype(o_ref.dtype)            # (1, tile_n) lane-dense store


@functools.partial(jax.jit, static_argnames=("tile_n",))
def discriminator_forward(x, params, tile_n=512):
    """x: (N, input_dim) float32. Returns (N, 1) float32 in [0, 1]."""
    w1, b1, w2, b2, w3, b3 = params
    n, in_dim = x.shape
    assert w1.shape[1] == in_dim

    # Batch tile: >= 128 lanes, and capped so the grid has >= 2 steps when the
    # batch allows it (keeps both v7x TensorCores busy).
    tile_n = max(128, min(tile_n, 128 * pl.cdiv(n, 256)))
    n_pad = pl.cdiv(n, tile_n) * tile_n

    # Lane-dense layout: (in_dim, n_pad), zero-padded rows are harmless.
    x_t = jnp.zeros((in_dim, n_pad), jnp.float32).at[:, :n].set(x.T)

    grid = (n_pad // tile_n,)
    rep = lambda a: pl.BlockSpec(a.shape, lambda i: (0, 0))  # weights stay resident

    n_weight_bytes = sum(int(p.size) for p in params) * 4
    cost = pl.CostEstimate(
        flops=2 * n_pad * (in_dim * 64 + 64 * 32 + 32),
        transcendentals=2 * n_pad,                 # exp + rcp per output element
        bytes_accessed=(in_dim + 1) * n_pad * 4 + n_weight_bytes,
    )

    out = pl.pallas_call(
        _mlp_kernel,
        out_shape=jax.ShapeDtypeStruct((1, n_pad), jnp.float32),
        grid_spec=pltpu.PrefetchScalarGridSpec(
            num_scalar_prefetch=0,
            grid=grid,
            in_specs=[
                pl.BlockSpec((in_dim, tile_n), lambda i: (0, i)),
                rep(w1), rep(b1), rep(w2), rep(b2), rep(w3), rep(b3),
            ],
            out_specs=pl.BlockSpec((1, tile_n), lambda i: (0, i)),
        ),
        compiler_params=pltpu.CompilerParams(
            dimension_semantics=("parallel",),
        ),
        cost_estimate=cost,
    )(x_t, w1, b1, w2, b2, w3, b3)

    return out[0, :n].reshape(n, 1)


def init_params(key, input_dim=1):
    """Deterministic init mimicking nn.Linear's U(-1/sqrt(fan_in), 1/sqrt(fan_in)).

    Weights are stored PyTorch-style (out_features, in_features); biases as
    (out_features, 1) columns so they broadcast over the lane (batch) axis.
    """
    dims = [(input_dim, 64), (64, 32), (32, 1)]
    params = []
    for (fan_in, fan_out) in dims:
        key, kw, kb = jax.random.split(key, 3)
        bound = 1.0 / jnp.sqrt(jnp.float32(fan_in))
        w = jax.random.uniform(kw, (fan_out, fan_in), jnp.float32, -bound, bound)
        b = jax.random.uniform(kb, (fan_out, 1), jnp.float32, -bound, bound)
        params += [w, b]
    return tuple(params)


def _reference_forward(x, params):
    w1, b1, w2, b2, w3, b3 = params
    leaky = lambda v: jnp.where(v > 0, v, _NEG_SLOPE * v)
    h = leaky(x @ w1.T + b1.T)
    h = leaky(h @ w2.T + b2.T)
    return jax.nn.sigmoid(h @ w3.T + b3.T)


if __name__ == "__main__":
    key = jax.random.PRNGKey(0)
    key, kx = jax.random.split(key)

    input_dim = 1
    batch = 500  # deliberately not a multiple of the tile: exercises the padded path

    x = jax.random.normal(kx, (batch, input_dim), jnp.float32)
    params = init_params(key, input_dim=input_dim)

    out = discriminator_forward(x, params, tile_n=128)  # grid of 4 lane-dense tiles
    out = jax.block_until_ready(out)

    ref = _reference_forward(x, params)
    assert out.shape == (batch, 1)
    assert jnp.allclose(out, ref, atol=1e-4, rtol=1e-4), "mismatch vs reference"

    print("KERNEL_OK")
</pallas_src>

<mosaic_0001>
module attributes {stable_mosaic.version = 11 : i64} {
  func.func @_mlp_kernel(%arg0: i32, %arg1: memref<1x128xf32, #tpu.memory_space<vmem>>, %arg2: memref<64x1xf32, #tpu.memory_space<vmem>>, %arg3: memref<64x1xf32, #tpu.memory_space<vmem>>, %arg4: memref<32x64xf32, #tpu.memory_space<vmem>>, %arg5: memref<32x1xf32, #tpu.memory_space<vmem>>, %arg6: memref<1x32xf32, #tpu.memory_space<vmem>>, %arg7: memref<1x1xf32, #tpu.memory_space<vmem>>, %arg8: memref<1x128xf32, #tpu.memory_space<vmem>>) attributes {dimension_semantics = [#tpu.dimension_semantics<parallel>], iteration_bounds = array<i64: 4>, scalar_prefetch = 0 : i64, scratch_operands = 0 : i64, tpu.core_type = #tpu.core_type<tc>, window_params = [{transform_indices = @transform_0, window_bounds = array<i64: 1, 128>}, {pipeline_mode = #tpu.pipeline_mode<synchronous>, transform_indices = @transform_1, window_bounds = array<i64: 64, 1>}, {pipeline_mode = #tpu.pipeline_mode<synchronous>, transform_indices = @transform_2, window_bounds = array<i64: 64, 1>}, {pipeline_mode = #tpu.pipeline_mode<synchronous>, transform_indices = @transform_3, window_bounds = array<i64: 32, 64>}, {pipeline_mode = #tpu.pipeline_mode<synchronous>, transform_indices = @transform_4, window_bounds = array<i64: 32, 1>}, {pipeline_mode = #tpu.pipeline_mode<synchronous>, transform_indices = @transform_5, window_bounds = array<i64: 1, 32>}, {pipeline_mode = #tpu.pipeline_mode<synchronous>, transform_indices = @transform_6, window_bounds = array<i64: 1, 1>}, {transform_indices = @transform_7, window_bounds = array<i64: 1, 128>}]} {
    %c0 = arith.constant 0 : index
    %c0_0 = arith.constant 0 : index
    %0 = vector.load %arg1[%c0, %c0_0] : memref<1x128xf32, #tpu.memory_space<vmem>>, vector<1x128xf32>
    %c0_1 = arith.constant 0 : index
    %c0_2 = arith.constant 0 : index
    %1 = vector.load %arg2[%c0_1, %c0_2] : memref<64x1xf32, #tpu.memory_space<vmem>>, vector<64x1xf32>
    %c0_3 = arith.constant 0 : index
    %c0_4 = arith.constant 0 : index
    %2 = vector.load %arg3[%c0_3, %c0_4] : memref<64x1xf32, #tpu.memory_space<vmem>>, vector<64x1xf32>
    %3 = vector.broadcast %1 : vector<64x1xf32> to vector<64x128xf32>
    %4 = vector.broadcast %0 : vector<1x128xf32> to vector<64x128xf32>
    %5 = arith.mulf %3, %4 : vector<64x128xf32>
    %6 = vector.broadcast %2 : vector<64x1xf32> to vector<64x128xf32>
    %7 = arith.addf %6, %5 : vector<64x128xf32>
    %cst = arith.constant 0.000000e+00 : f32
    %8 = vector.broadcast %cst : f32 to vector<64x128xf32>
    %9 = arith.cmpf ogt, %7, %8 : vector<64x128xf32>
    %cst_5 = arith.constant 0.00999999977 : f32
    %10 = vector.broadcast %cst_5 : f32 to vector<64x128xf32>
    %11 = arith.mulf %10, %7 : vector<64x128xf32>
    %12 = arith.select %9, %7, %11 : vector<64x128xi1>, vector<64x128xf32>
    %c0_6 = arith.constant 0 : index
    %c0_7 = arith.constant 0 : index
    %13 = vector.load %arg4[%c0_6, %c0_7] : memref<32x64xf32, #tpu.memory_space<vmem>>, vector<32x64xf32>
    %cst_8 = arith.constant dense<0.000000e+00> : vector<32x128xf32>
    %14 = tpu.matmul %13, %12, %cst_8 {dimension_numbers = #tpu.dot_dimension_numbers<[1], [0], [0], [1], [0, 0, 1, 1], [], []>} : vector<32x64xf32>, vector<64x128xf32>, vector<32x128xf32> -> vector<32x128xf32>
    %c0_9 = arith.constant 0 : index
    %c0_10 = arith.constant 0 : index
    %15 = vector.load %arg5[%c0_9, %c0_10] : memref<32x1xf32, #tpu.memory_space<vmem>>, vector<32x1xf32>
    %16 = vector.broadcast %15 : vector<32x1xf32> to vector<32x128xf32>
    %17 = arith.addf %14, %16 : vector<32x128xf32>
    %cst_11 = arith.constant 0.000000e+00 : f32
    %18 = vector.broadcast %cst_11 : f32 to vector<32x128xf32>
    %19 = arith.cmpf ogt, %17, %18 : vector<32x128xf32>
    %cst_12 = arith.constant 0.00999999977 : f32
    %20 = vector.broadcast %cst_12 : f32 to vector<32x128xf32>
    %21 = arith.mulf %20, %17 : vector<32x128xf32>
    %22 = arith.select %19, %17, %21 : vector<32x128xi1>, vector<32x128xf32>
    %c0_13 = arith.constant 0 : index
    %c0_14 = arith.constant 0 : index
    %23 = vector.load %arg6[%c0_13, %c0_14] : memref<1x32xf32, #tpu.memory_space<vmem>>, vector<1x32xf32>
    %cst_15 = arith.constant dense<0.000000e+00> : vector<1x128xf32>
    %24 = tpu.matmul %23, %22, %cst_15 {dimension_numbers = #tpu.dot_dimension_numbers<[1], [0], [0], [1], [0, 0, 1, 1], [], []>} : vector<1x32xf32>, vector<32x128xf32>, vector<1x128xf32> -> vector<1x128xf32>
    %c0_16 = arith.constant 0 : index
    %c0_17 = arith.constant 0 : index
    %25 = vector.load %arg7[%c0_16, %c0_17] : memref<1x1xf32, #tpu.memory_space<vmem>>, vector<1x1xf32>
    %26 = vector.broadcast %25 : vector<1x1xf32> to vector<1x128xf32>
    %27 = arith.addf %24, %26 : vector<1x128xf32>
    %cst_18 = arith.constant -6.000000e+01 : f32
    %cst_19 = arith.constant 6.000000e+01 : f32
    %28 = vector.broadcast %cst_18 : f32 to vector<1x128xf32>
    %29 = arith.maximumf %28, %27 : vector<1x128xf32>
    %30 = vector.broadcast %cst_19 : f32 to vector<1x128xf32>
    %31 = arith.minimumf %30, %29 : vector<1x128xf32>
    %cst_20 = arith.constant 0.000000e+00 : f32
    %32 = vector.broadcast %cst_20 : f32 to vector<1x128xf32>
    %33 = arith.subf %32, %31 : vector<1x128xf32>
    %34 = math.exp %33 : vector<1x128xf32>
    %cst_21 = arith.constant 1.000000e+00 : f32
    %35 = vector.broadcast %cst_21 : f32 to vector<1x128xf32>
    %36 = arith.addf %35, %34 : vector<1x128xf32>
    %37 = tpu.reciprocal %36 {approx = true} : vector<1x128xf32> -> vector<1x128xf32>
    %38 = arith.mulf %36, %37 : vector<1x128xf32>
    %cst_22 = arith.constant 2.000000e+00 : f32
    %39 = vector.broadcast %cst_22 : f32 to vector<1x128xf32>
    %40 = arith.subf %39, %38 : vector<1x128xf32>
    %41 = arith.mulf %37, %40 : vector<1x128xf32>
    %c0_23 = arith.constant 0 : index
    %c0_24 = arith.constant 0 : index
    %42 = vector.load %arg8[%c0_23, %c0_24] : memref<1x128xf32, #tpu.memory_space<vmem>>, vector<1x128xf32>
    tpu.vector_store %arg8[%c0_23, %c0_24], %41 {strides = array<i32>} : memref<1x128xf32, #tpu.memory_space<vmem>>, vector<1x128xf32>,
    return
  }
  func.func @transform_0(%arg0: i32) -> (i32, i32) {
    %c0_i32 = arith.constant 0 : i32
    %c0_i32_0 = arith.constant 0 : i32
    return %c0_i32, %arg0 : i32, i32
  }
  func.func @transform_1(%arg0: i32) -> (i32, i32) {
    %c0_i32 = arith.constant 0 : i32
    %c0_i32_0 = arith.constant 0 : i32
    %c0_i32_1 = arith.constant 0 : i32
    return %c0_i32, %c0_i32_0 : i32, i32
  }
  func.func @transform_2(%arg0: i32) -> (i32, i32) {
    %c0_i32 = arith.constant 0 : i32
    %c0_i32_0 = arith.constant 0 : i32
    %c0_i32_1 = arith.constant 0 : i32
    return %c0_i32, %c0_i32_0 : i32, i32
  }
  func.func @transform_3(%arg0: i32) -> (i32, i32) {
    %c0_i32 = arith.constant 0 : i32
    %c0_i32_0 = arith.constant 0 : i32
    %c0_i32_1 = arith.constant 0 : i32
    return %c0_i32, %c0_i32_0 : i32, i32
  }
  func.func @transform_4(%arg0: i32) -> (i32, i32) {
    %c0_i32 = arith.constant 0 : i32
    %c0_i32_0 = arith.constant 0 : i32
    %c0_i32_1 = arith.constant 0 : i32
    return %c0_i32, %c0_i32_0 : i32, i32
  }
  func.func @transform_5(%arg0: i32) -> (i32, i32) {
    %c0_i32 = arith.constant 0 : i32
    %c0_i32_0 = arith.constant 0 : i32
    %c0_i32_1 = arith.constant 0 : i32
    return %c0_i32, %c0_i32_0 : i32, i32
  }
  func.func @transform_6(%arg0: i32) -> (i32, i32) {
    %c0_i32 = arith.constant 0 : i32
    %c0_i32_0 = arith.constant 0 : i32
    %c0_i32_1 = arith.constant 0 : i32
    return %c0_i32, %c0_i32_0 : i32, i32
  }
  func.func @transform_7(%arg0: i32) -> (i32, i32) {
    %c0_i32 = arith.constant 0 : i32
    %c0_i32_0 = arith.constant 0 : i32
    return %c0_i32, %arg0 : i32, i32
  }
}

</mosaic_0001>

<bundles_post_ra>
// kernel: discriminator_forward.1
= control target key start
LH: loop header
LB: loop body
LE: loop exit
PB: predicated region body
PF: predicated region fallthrough
CT: control target
= control target key end

     0   :  { %s827_s26 = smov 0   ;;  %s931_s0 = inlined_call_operand.vmem [shape: f32[1,512], index: 0, kind: input, shape index: {}]   ;;  %s932_s1 = inlined_call_operand.vmem [shape: f32[64,1], index: 1, kind: input, shape index: {}]   ;;  %s933_s2 = inlined_call_operand.vmem [shape: f32[64,1], index: 2, kind: input, shape index: {}]   ;;  %s934_s3 = inlined_call_operand.vmem [shape: f32[32,64], index: 3, kind: input, shape index: {}]   ;;  %s935_s4 = inlined_call_operand.vmem [shape: f32[32,1], index: 4, kind: input, shape index: {}]   ;;  %s936_s5 = inlined_call_operand.vmem [shape: f32[1,32], index: 5, kind: input, shape index: {}]   ;;  %s937_s6 = inlined_call_operand.<no memory space> [shape: f32[1,1], index: 6, kind: input, shape index: {}]   ;;  %s938_s7 = inlined_call_operand.vmem [shape: f32[1,512], index: 7, kind: output, shape index: {}]  }
   0x1   :  { %v12_v0 = vstv %s937_s6 }
   0x2   :  { %13 = vst [vmem:[#allocation2] sm:$0x1] %v12_v0 }
   0x3 LB: > { %s692_s27 = sadd.s32 4294967295, %s779_s26   ;;  %p696_p0 = scmp.ge.s32.totalorder %s779_s26, 1  ;;  %s779_s26 = sphi %s827_s26, %s19_s26  }
   0x4   : > { %p237_p1 = scmp.lt.s32.totalorder %s779_s26, 5 }
   0x6   : > { %p238_p2 = pnand %p696_p0, %p237_p1 }
   0x7   : > { %p265_p3 = scmp.lt.s32.totalorder (!%p238_p2), %s692_s27, 3 }
   0x8   : > { %241 = sbr.rel (%p238_p2) target bundleno = 623 (0x26f), region = 48 }
   0xd   : > { %v287_v1 = vld [vmem:[%s933_s2 + $0x38] sm:$0xff]  ;;  %v781_v3 = vmov 0   ;;  %v278_v4 = vld [vmem:[%s932_s1 + $0x30] sm:$0xff]  ;;  %v277_v5 = vld [vmem:[%s932_s1 + $0x28] sm:$0xff]  ;;  %vm442_vm0 = vcmask 523264   ;;  %s940_s27 = smov (!%p265_p3, %s692_s27), 3 }
   0xe   : > { %v279_v2 = vld [vmem:[%s932_s1 + $0x38] sm:$0xff]  ;;  %768 = vset.pattern.permute.xlu1 %v781_v3  ;;  %767 = vset.pattern.permute.xlu0 %v781_v3  ;;  %v286_v6 = vld [vmem:[%s933_s2 + $0x30] sm:$0xff]  ;;  %v276_v7 = vld [vmem:[%s932_s1 + $0x20] sm:$0xff]  ;;  %s267_s28 = scalar_lea.vmem %s931_s0, %s940_s27  ;;  %vm783_vm9 = vmmov 0   ;;  %vm563_vm14 = vcmask 261120   ;;  %s270_s15 = scalar_lea.vmem %s938_s7, %s940_s27 }
   0xf   : > { %379 = vperm.xlu1 %768, %v287_v1   ;;  %325 = vperm.xlu0 %767, %v279_v2   ;;  %v285_v8 = vld [vmem:[%s933_s2 + $0x28] sm:$0xff]  ;;  %v275_v9 = vld [vmem:[%s932_s1 + $0x18] sm:$0xff]  ;;  %v284_v10 = vld [vmem:[%s933_s2 + $0x20] sm:$0xff] }
  0x10   : > { %v274_v11 = vld [vmem:[%s932_s1 + $0x10] sm:$0xff]  ;;  %v283_v12 = vld [vmem:[%s933_s2 + $0x18] sm:$0xff]  ;;  %v273_v13 = vld [vmem:[%s932_s1 + $0x8] sm:$0xff] }
  0x11   : > { %v282_v14 = vld [vmem:[%s933_s2 + $0x10] sm:$0xff]  ;;  %v272_v15 = vld [vmem:[%s932_s1] sm:$0xff]  ;;  %v281_v16 = vld [vmem:[%s933_s2 + $0x8] sm:$0xff] }
  0x12   : > { %v280_v17 = vld [vmem:[%s933_s2] sm:$0xff]  ;;  %v421_v18 = vld [vmem:[%s935_s4 + $0x18] sm:$0xff]  ;;  %v420_v19 = vld [vmem:[%s935_s4 + $0x10] sm:$0xff] }
  0x13   : > { %320 = vperm.xlu0 %767, %v278_v4   ;;  %315 = vperm.xlu1 %768, %v277_v5   ;;  %v414_v20 = vld [vmem:[%s934_s3] sm:$0xff]  ;;  %v419_v21 = vld [vmem:[%s935_s4 + $0x8] sm:$0xff] }
  0x14   : > { %v418_v22 = vld [vmem:[%s935_s4] sm:$0xff]  ;;  %739 = vmatprep.mubr.msk.f32.mxu0 %vm442_vm0, %v414_v20 }
  0x15   : > { %v553_v23 = vld [vmem:[#allocation2] sm:$0x1] }
  0x16   : > { %v697_v24 = vld [vmem:[%s267_s28] ss:$0 sm:$0xff] }
  0x17   : > { %374 = vperm.xlu0 %767, %v286_v6   ;;  %310 = vperm.xlu1 %768, %v276_v7  }
  0x1b   : > { %369 = vperm.xlu0 %767, %v285_v8   ;;  %305 = vperm.xlu1 %768, %v275_v9   ;;  %v415_v9 = vld [vmem:[%s934_s3 + $0x8] sm:$0xff] }
  0x1f   : > { %364 = vperm.xlu0 %767, %v284_v10   ;;  %300 = vperm.xlu1 %768, %v274_v11   ;;  %v416_v10 = vld [vmem:[%s934_s3 + $0x10] sm:$0xff]  ;;  %v417_v11 = vld [vmem:[%s934_s3 + $0x18] sm:$0xff] }
  0x23   : > { %359 = vperm.xlu0 %767, %v283_v12   ;;  %295 = vperm.xlu1 %768, %v273_v13   ;;  %v782_v12 = vmov 0.0  }
  0x24   : > { %745 = vmatprep.subr.mxu1 %v782_v12  ;;  %753 = vmatprep.mubr.msk.f32.mxu1 %vm783_vm9, %v782_v12 }
  0x27   : > { %354 = vperm.xlu0 %767, %v282_v14   ;;  %290 = vperm.xlu1 %768, %v272_v15  }
  0x2b   : > { %349 = vperm.xlu0 %767, %v281_v16   ;;  %344 = vperm.xlu1 %768, %v280_v17  }
  0x2f   : > { %439 = vperm.xlu0 %767, %v421_v18   ;;  %434 = vperm.xlu1 %768, %v420_v19  }
  0x33   : > { %429 = vperm.xlu0 %767, %v419_v21   ;;  %424 = vperm.xlu1 %768, %v418_v22  }
  0x37   : > { %556 = vperm.xlu0 %767, %v553_v23  }
  0x8a   : > { %v380_v25 = vpop.permute.xlu1 %379  ;;  %v326_v26 = vpop.permute.xlu0 %325 }
  0x8b   : > { %v341_v27 = vmul.f32 %v697_v24, %v326_v26 }
  0x8d   : > { %v389_v28 = vadd.f32 %v380_v25, %v341_v27 }
  0x8e   : > { %v321_v29 = vpop.permute.xlu0 %320  ;;  %v316_v30 = vpop.permute.xlu1 %315 }
  0x8f   : > { %vm397_vm1 = vcmp.gt.f32.partialorder %v389_v28, 0.0  ;;  %v405_v31 = vmul.f32 0.01, %v389_v28  ;;  %v340_v32 = vmul.f32 %v697_v24, %v321_v29  ;;  %v339_v37 = vmul.f32 %v697_v24, %v316_v30 }
  0x91   : > { %v413_v33 = vsel %vm397_vm1, %v389_v28, %v405_v31 }
  0x92   : > { %v375_v34 = vpop.permute.xlu0 %374  ;;  %v311_v35 = vpop.permute.xlu1 %310  ;;  %723 = vmatprep.subr.mxu0 %v413_v33 }
  0x93   : > { %v388_v36 = vadd.f32 %v375_v34, %v340_v32  ;;  %724 = vmatpush3.msra.mxu0 %v413_v33  ;;  %v338_v43 = vmul.f32 %v697_v24, %v311_v35  ;;  %v552_v32 = vld [vmem:[%s936_s5] sm:$0x1]  ;;  %v559_v34 = vlaneseq }
  0x95   : > { %v404_v38 = vmul.f32 0.01, %v388_v36  ;;  %vm396_vm2 = vcmp.gt.f32.partialorder %v388_v36, 0.0  ;;  %v560_v35 = vshrl.u32 %v559_v34, 7 }
  0x96   : > { %v370_v39 = vpop.permute.xlu0 %369  ;;  %v306_v40 = vpop.permute.xlu1 %305 }
  0x97   : > { %v387_v41 = vadd.f32 %v370_v39, %v339_v37  ;;  %v412_v42 = vsel %vm396_vm2, %v388_v36, %v404_v38  ;;  %v337_v49 = vmul.f32 %v697_v24, %v306_v40  ;;  %v561_v36 = vsub.s32 0, %v560_v35 }
  0x98   : > { %725 = vmatprep.subr.mxu0 %v412_v42 }
  0x99   : > { %v403_v44 = vmul.f32 0.01, %v387_v41  ;;  %726 = vmatpush3.msra.mxu0 %v412_v42  ;;  %vm395_vm3 = vcmp.gt.f32.partialorder %v387_v41, 0.0 }
  0x9a   : > { %v365_v45 = vpop.permute.xlu0 %364  ;;  %v301_v46 = vpop.permute.xlu1 %300 }
  0x9b   : > { %v386_v47 = vadd.f32 %v365_v45, %v338_v43  ;;  %v411_v48 = vsel %vm395_vm3, %v387_v41, %v403_v44  ;;  %v336_v55 = vmul.f32 %v697_v24, %v301_v46 }
  0x9c   : > { %727 = vmatprep.subr.mxu0 %v411_v48 }
  0x9d   : > { %v402_v50 = vmul.f32 0.01, %v386_v47  ;;  %728 = vmatpush3.msra.mxu0 %v411_v48  ;;  %vm394_vm4 = vcmp.gt.f32.partialorder %v386_v47, 0.0 }
  0x9e   : > { %v360_v51 = vpop.permute.xlu0 %359  ;;  %v296_v52 = vpop.permute.xlu1 %295 }
  0x9f   : > { %v385_v53 = vadd.f32 %v360_v51, %v337_v49  ;;  %v410_v54 = vsel %vm394_vm4, %v386_v47, %v402_v50  ;;  %v335_v61 = vmul.f32 %v697_v24, %v296_v52 }
  0xa0   : > { %729 = vmatprep.subr.mxu0 %v410_v54 }
  0xa1   : > { %v401_v56 = vmul.f32 0.01, %v385_v53  ;;  %730 = vmatpush3.msra.mxu0 %v410_v54  ;;  %vm393_vm5 = vcmp.gt.f32.partialorder %v385_v53, 0.0 }
  0xa2   : > { %v355_v57 = vpop.permute.xlu0 %354  ;;  %v291_v58 = vpop.permute.xlu1 %290 }
  0xa3   : > { %v384_v59 = vadd.f32 %v355_v57, %v336_v55  ;;  %v409_v60 = vsel %vm393_vm5, %v385_v53, %v401_v56  ;;  %v334_v63 = vmul.f32 %v697_v24, %v291_v58 }
  0xa4   : > { %731 = vmatprep.subr.mxu0 %v409_v60 }
  0xa5   : > { %v400_v62 = vmul.f32 0.01, %v384_v59  ;;  %732 = vmatpush3.msra.mxu0 %v409_v60  ;;  %vm392_vm6 = vcmp.gt.f32.partialorder %v384_v59, 0.0 }
  0xa6   : > { %v350_v0 = vpop.permute.xlu0 %349  ;;  %v345_v1 = vpop.permute.xlu1 %344 }
  0xa7   : > { %v383_v2 = vadd.f32 %v350_v0, %v335_v61  ;;  %v382_v3 = vadd.f32 %v345_v1, %v334_v63  ;;  %v408_v4 = vsel %vm392_vm6, %v384_v59, %v400_v62 }
  0xa8   : > { %733 = vmatprep.subr.mxu0 %v408_v4 }
  0xa9   : > { %v399_v5 = vmul.f32 0.01, %v383_v2  ;;  %v398_v6 = vmul.f32 0.01, %v382_v3  ;;  %734 = vmatpush3.msra.mxu0 %v408_v4  ;;  %vm391_vm7 = vcmp.gt.f32.partialorder %v383_v2, 0.0  ;;  %vm390_vm8 = vcmp.gt.f32.partialorder %v382_v3, 0.0 }
  0xaa   : > { %v440_v13 = vpop.permute.xlu0 %439  ;;  %v435_v14 = vpop.permute.xlu1 %434 }
  0xab   : > { %v407_v7 = vsel %vm391_vm7, %v383_v2, %v399_v5  ;;  %v406_v8 = vsel %vm390_vm8, %v382_v3, %v398_v6 }
  0xac   : > { %735 = vmatprep.subr.mxu0 %v407_v7 }
  0xad   : > { %736 = vmatpush3.msra.mxu0 %v407_v7 }
  0xae   : > { %737 = vmatprep.subr.mxu0 %v406_v8  ;;  %v430_v17 = vpop.permute.xlu0 %429  ;;  %v425_v21 = vpop.permute.xlu1 %424 }
  0xaf   : > { %738 = vmatpush3.msra.mxu0 %v406_v8 }
  0xb0   : > { %740 = vmatmul.mubr.msk.f32.vlgmr.msra.gmra.mxu0 %vm442_vm0, %v415_v9 }
  0xb1   : > { %742 = vmatprep.mubr.msk.f32.mxu0 %vm442_vm0, %v416_v10 }
  0xb2   : > { %v557_v37 = vpop.permute.xlu0 %556 }
  0xb3   : > { %v562_v38 = vrot.slane %v557_v37, %v561_v36 }
  0xb4   : > { %743 = vmatmul.mubr.msk.f32.gmra.mxu0 %vm442_vm0, %v417_v11 }
 0x170   : > { %v741_v15 = vpop.f32.mrf.mxu0 }
 0x171   : > { %v527_v19 = vadd.f32 %v741_v15, %v430_v17 }
 0x172   : > { %v521_v16 = vpop.f32.mrf.mxu0 }
 0x173   : > { %v522_v23 = vadd.f32 %v521_v16, %v425_v21  ;;  %v545_v26 = vmul.f32 0.01, %v527_v19  ;;  %vm541_vm12 = vcmp.gt.f32.partialorder %v527_v19, 0.0 }
 0x174   : > { %v744_v18 = vpop.f32.mrf.mxu0 }
 0x175   : > { %v537_v20 = vadd.f32 %v744_v18, %v440_v13  ;;  %v544_v29 = vmul.f32 0.01, %v522_v23  ;;  %vm540_vm13 = vcmp.gt.f32.partialorder %v522_v23, 0.0  ;;  %v549_v31 = vsel %vm541_vm12, %v527_v19, %v545_v26 }
 0x176   : > { %v531_v22 = vpop.f32.mrf.mxu0 }
 0x177   : > { %v532_v24 = vadd.f32 %v531_v22, %v435_v14  ;;  %vm543_vm10 = vcmp.gt.f32.partialorder %v537_v20, 0.0  ;;  %v547_v25 = vmul.f32 0.01, %v537_v20  ;;  %v548_v33 = vsel %vm540_vm13, %v522_v23, %v544_v29 }
 0x179   : > { %v546_v27 = vmul.f32 0.01, %v532_v24  ;;  %v551_v28 = vsel %vm543_vm10, %v537_v20, %v547_v25  ;;  %vm542_vm11 = vcmp.gt.f32.partialorder %v532_v24, 0.0 }
 0x17a   : > { %746 = vmatpush3.msra.mxu1 %v551_v28 }
 0x17b   : > { %747 = vmatprep.subr.mxu1 %v782_v12  ;;  %v550_v30 = vsel %vm542_vm11, %v532_v24, %v546_v27 }
 0x17c   : > { %748 = vmatpush3.msra.mxu1 %v550_v30 }
 0x17d   : > { %749 = vmatprep.subr.mxu1 %v782_v12 }
 0x17e   : > { %750 = vmatpush3.msra.mxu1 %v549_v31 }
 0x17f   : > { %751 = vmatprep.subr.mxu1 %v782_v12 }
 0x180   : > { %752 = vmatpush3.msra.mxu1 %v548_v33 }
 0x181   : > { %754 = vmatmul.mubr.msk.f32.vlgmr.msra.gmra.mxu1 %vm563_vm14, %v552_v32 }
 0x241   : > { %v633_v39 = vpop.f32.mrf.mxu1 }
 0x242   : > { %v634_v40 = vadd.f32 %v633_v39, %v562_v38 }
 0x243   : > { %v755_v41 = vpop.f32.mrf.mxu1 }
 0x244   : > { %v703_v42 = vclamps-f32 %v634_v40, 60.0 }
 0x246   : > { %v639_v43 = vsub.f32 0.0, %v703_v42 }
 0x248   : > { %v640_v44 = vmul.f32 1.442695, %v639_v43 }
 0x24a   : > { %769 = vpow2.f32 %v640_v44 }
 0x257   : > { %v770_v45 = vpop.eup %769 }
 0x258   : > { %v642_v46 = vadd.f32 1.0, %v770_v45 }
 0x25a   : > { %771 = vrcp.f32 %v642_v46 }
 0x267   : > { %v772_v47 = vpop.eup %771 }
 0x268   : > { %v644_v48 = vmul.f32 %v772_v47, %v642_v46 }
 0x26a   : > { %v645_v49 = vsub.f32 2.0, %v644_v48 }
 0x26c   : > { %v646_v50 = vmul.f32 %v772_v47, %v645_v49 }
 0x26e   : > { %647 = vst [vmem:[%s270_s15] sm:$0x1] %v646_v50 }
 0x26f PF: > { %s19_s26 = sadd.s32 1, %s779_s26  }
 0x270   : > { %p16_p4 = scmp.ge.s32.totalorder %s19_s26, 6  }
 0x272   :  { %18 = sbr.rel (!%p16_p4) target bundleno = 3 (0x3), region = 78 }

</bundles_post_ra>
